<compile_context>
chip_gen: v7x
topology: tpu7x:2x2x1
jax: 0.10.0
libtpu: 0.0.40
codegen_flags: <defaults>
</compile_context>

<pallas_src>
import jax
import jax.numpy as jnp
from jax import lax
from jax.experimental import pallas as pl
from jax.experimental.pallas import tpu as pltpu


def _round_up(x: int, m: int) -> int:
    return (x + m - 1) // m * m


def _pick_tile(padded: int, align: int, max_tile: int) -> int:
    """Largest multiple of `align` that divides `padded`, capped at max_tile."""
    if padded <= max_tile:
        return padded
    best = align
    t = align
    while t <= max_tile:
        if padded % t == 0:
            best = t
        t += align
    return best


def _pad2d(a, rows, cols):
    r, c = a.shape
    if (r, c) == (rows, cols):
        return a
    return jnp.zeros((rows, cols), a.dtype).at[:r, :c].set(a)


# ----------------------------------------------------------------------------
# Kernel: one (tm, tn) output tile, accumulated over the K grid axis.
# ----------------------------------------------------------------------------
def _body(x_ref, w_ref, ix_ref, iw_ref, o_ref, acc_ref):
    k = pl.program_id(2)

    @pl.when(k == 0)
    def _init():
        acc_ref[...] = jnp.zeros_like(acc_ref)

    # (tm, tk) . (tn, tk)^T on the MXU; bf16 operands, f32 accumulation.
    acc_ref[...] += lax.dot_general(
        x_ref[...], w_ref[...],
        dimension_numbers=(((1,), (1,)), ((), ())),
        preferred_element_type=jnp.float32)

    @pl.when(k == pl.num_programs(2) - 1)
    def _finalize():
        # ix = scale / ||x|| (per row), iw = 1 / ||w|| (per out-feature), both f32.
        o_ref[...] = (acc_ref[...] * ix_ref[...] * iw_ref[...]).astype(o_ref.dtype)


def _kernel_acc_in_out(x_ref, w_ref, ix_ref, iw_ref, o_ref):
    # f32 output: accumulate directly into the resident output block.
    _body(x_ref, w_ref, ix_ref, iw_ref, o_ref, o_ref)


def _kernel_acc_scratch(x_ref, w_ref, ix_ref, iw_ref, o_ref, acc_ref):
    _body(x_ref, w_ref, ix_ref, iw_ref, o_ref, acc_ref)


# ----------------------------------------------------------------------------
# Wrapper
# ----------------------------------------------------------------------------
def normed_linear(x, weight, *, scale=40.0, out_dtype=jnp.float32,
                  tm_max=512, tn_max=512, tk_max=1024):
    """out = F.normalize(x, dim=1) @ F.normalize(weight, dim=1).T * scale

    x:      (B, in_features)             float
    weight: (out_features, in_features)  (torch nn.Linear layout)
    """
    B, K = x.shape
    N, K2 = weight.shape
    assert K == K2, (x.shape, weight.shape)

    # --- inverse L2 norms in f32 on the un-quantized inputs (eps = 1e-12) ---
    x32 = x.astype(jnp.float32)
    w32 = weight.astype(jnp.float32)
    inv_x = float(scale) * lax.rsqrt(
        jnp.maximum(jnp.sum(x32 * x32, axis=1, keepdims=True), 1e-24))    # (B, 1)
    inv_w = lax.rsqrt(
        jnp.maximum(jnp.sum(w32 * w32, axis=1), 1e-24))[None, :]          # (1, N)

    # --- minimal alignment padding, then divisor-based tiles ---
    Mp = _round_up(B, 16)      # bf16 sublane packing
    Np = _round_up(N, 128)     # lanes
    Kp = _round_up(K, 128)     # lanes

    tm = _pick_tile(Mp, 16, tm_max)
    tn = _pick_tile(Np, 128, tn_max)
    tk = _pick_tile(Kp, 128, tk_max)

    # Keep >= 2 programs on a "parallel" axis when possible so v7x's second
    # TensorCore is not idle for small-batch shapes.
    if (Mp // tm) * (Np // tn) == 1 and Np >= 256:
        tn = _pick_tile(Np, 128, Np // 2)

    grid = (Mp // tm, Np // tn, Kp // tk)

    # bf16 MXU feed.  W stays in its native (N, K) layout (no transpose pass);
    # padding is only applied when the shape actually needs it.
    xp = _pad2d(x.astype(jnp.bfloat16), Mp, Kp)
    wp = _pad2d(weight.astype(jnp.bfloat16), Np, Kp)
    ixp = _pad2d(inv_x, Mp, 1)
    iwp = _pad2d(inv_w, 1, Np)

    f32_out = jnp.dtype(out_dtype) == jnp.dtype(jnp.float32)
    kernel = _kernel_acc_in_out if f32_out else _kernel_acc_scratch
    scratch = [] if f32_out else [pltpu.VMEM((tm, tn), jnp.float32)]

    out = pl.pallas_call(
        kernel,
        out_shape=jax.ShapeDtypeStruct((Mp, Np), out_dtype),
        grid_spec=pltpu.PrefetchScalarGridSpec(
            num_scalar_prefetch=0,
            grid=grid,
            in_specs=[
                pl.BlockSpec((tm, tk), lambda i, j, k: (i, k)),   # x tile
                pl.BlockSpec((tn, tk), lambda i, j, k: (j, k)),   # W tile (native layout)
                pl.BlockSpec((tm, 1), lambda i, j, k: (i, 0)),    # scale / ||x||
                pl.BlockSpec((1, tn), lambda i, j, k: (0, j)),    # 1 / ||w||
            ],
            out_specs=pl.BlockSpec((tm, tn), lambda i, j, k: (i, j)),
            scratch_shapes=scratch,
        ),
        compiler_params=pltpu.CompilerParams(
            dimension_semantics=("parallel", "parallel", "arbitrary"),
            vmem_limit_bytes=32 * 1024 * 1024,
        ),
    )(xp, wp, ixp, iwp)
    return out[:B, :N]


# ----------------------------------------------------------------------------
# References
# ----------------------------------------------------------------------------
def _reference_f32(x, w, *, scale=40.0):
    xn = x / jnp.maximum(jnp.linalg.norm(x, axis=1, keepdims=True), 1e-12)
    wn = w / jnp.maximum(jnp.linalg.norm(w, axis=1, keepdims=True), 1e-12)
    return (xn @ wn.T) * scale


def _reference_bf16_feed(x, w, *, scale=40.0):
    # Same math as the kernel: bf16 MXU operands, f32 norms/accumulation.
    inv_x = lax.rsqrt(jnp.maximum(jnp.sum(x * x, axis=1, keepdims=True), 1e-24))
    inv_w = lax.rsqrt(jnp.maximum(jnp.sum(w * w, axis=1), 1e-24))[None, :]
    dot = jnp.dot(x.astype(jnp.bfloat16), w.astype(jnp.bfloat16).T,
                  preferred_element_type=jnp.float32)
    return dot * inv_x * inv_w * scale


if __name__ == "__main__":
    key = jax.random.PRNGKey(0)
    kx, kw, kx2, kw2 = jax.random.split(key, 4)

    # Small shape matching typical use (cluster head on a 128-d feature).
    B, In, Out, scale = 2, 128, 10, 40.0
    x = jax.random.normal(kx, (B, In), jnp.float32)
    w = jax.random.normal(kw, (Out, In), jnp.float32) * 0.05

    out = jax.block_until_ready(normed_linear(x, w, scale=scale))
    assert out.shape == (B, Out)
    assert jnp.allclose(out, _reference_bf16_feed(x, w, scale=scale),
                        atol=2e-3, rtol=2e-3)
    assert jnp.allclose(out, _reference_f32(x, w, scale=scale),
                        atol=2.5e-1, rtol=2e-2)

    # bf16-output path (exercises the f32 scratch-accumulator branch).
    out_bf = jax.block_until_ready(
        normed_linear(x, w, scale=scale, out_dtype=jnp.bfloat16))
    assert out_bf.dtype == jnp.bfloat16
    assert jnp.allclose(out_bf.astype(jnp.float32),
                        _reference_bf16_feed(x, w, scale=scale), atol=1.5e-1)

    # Larger shape exercising M/N/K alignment padding, a multi-program N grid
    # (v7x two-core split) and a non-power-of-two K tile (Kp = 640 -> tk = 640).
    B2, In2, Out2 = 150, 640, 300
    x2 = jax.random.normal(kx2, (B2, In2), jnp.float32)
    w2 = jax.random.normal(kw2, (Out2, In2), jnp.float32) * 0.05
    out2 = jax.block_until_ready(normed_linear(x2, w2, scale=scale))
    assert out2.shape == (B2, Out2)
    assert jnp.allclose(out2, _reference_bf16_feed(x2, w2, scale=scale),
                        atol=2e-3, rtol=2e-3)
    assert jnp.allclose(out2, _reference_f32(x2, w2, scale=scale),
                        atol=2.5e-1, rtol=2e-2)

    # Torch default init (weight filled with zeros) -> output exactly zero
    # (exercises the eps clamp path of F.normalize).
    w0 = jnp.zeros((Out, In), jnp.float32)
    out0 = jax.block_until_ready(normed_linear(x, w0, scale=scale))
    assert jnp.allclose(out0, jnp.zeros_like(out0), atol=1e-6)

    print("KERNEL_OK")
</pallas_src>

<mosaic_0001>
module attributes {stable_mosaic.version = 11 : i64} {
  func.func @_kernel_acc_in_out(%arg0: i32, %arg1: i32, %arg2: i32, %arg3: memref<16x128xbf16, #tpu.memory_space<vmem>>, %arg4: memref<128x128xbf16, #tpu.memory_space<vmem>>, %arg5: memref<16x1xf32, #tpu.memory_space<vmem>>, %arg6: memref<1x128xf32, #tpu.memory_space<vmem>>, %arg7: memref<16x128xf32, #tpu.memory_space<vmem>>) attributes {dimension_semantics = [#tpu.dimension_semantics<parallel>, #tpu.dimension_semantics<parallel>, #tpu.dimension_semantics<arbitrary>], iteration_bounds = array<i64: 1, 1, 1>, scalar_prefetch = 0 : i64, scratch_operands = 0 : i64, tpu.core_type = #tpu.core_type<tc>, window_params = [{transform_indices = @transform_0, window_bounds = array<i64: 16, 128>}, {transform_indices = @transform_1, window_bounds = array<i64: 128, 128>}, {transform_indices = @transform_2, window_bounds = array<i64: 16, 1>}, {transform_indices = @transform_3, window_bounds = array<i64: 1, 128>}, {transform_indices = @transform_4, window_bounds = array<i64: 16, 128>}]} {
    %c0_i32 = arith.constant 0 : i32
    %0 = arith.cmpi eq, %arg2, %c0_i32 : i32
    %1 = arith.extui %0 : i1 to i32
    %c0_i32_0 = arith.constant 0 : i32
    %2 = arith.cmpi ne, %1, %c0_i32_0 : i32
    scf.if %2 {
      %cst_10 = arith.constant 0.000000e+00 : f32
      %12 = vector.broadcast %cst_10 : f32 to vector<16x128xf32>
      %c0_11 = arith.constant 0 : index
      %c0_12 = arith.constant 0 : index
      %13 = vector.load %arg7[%c0_11, %c0_12] : memref<16x128xf32, #tpu.memory_space<vmem>>, vector<16x128xf32>
      tpu.vector_store %arg7[%c0_11, %c0_12], %12 {strides = array<i32>} : memref<16x128xf32, #tpu.memory_space<vmem>>, vector<16x128xf32>,
    } else {
    }
    %c0 = arith.constant 0 : index
    %c0_1 = arith.constant 0 : index
    %3 = vector.load %arg7[%c0, %c0_1] : memref<16x128xf32, #tpu.memory_space<vmem>>, vector<16x128xf32>
    %c0_2 = arith.constant 0 : index
    %c0_3 = arith.constant 0 : index
    %4 = vector.load %arg3[%c0_2, %c0_3] : memref<16x128xbf16, #tpu.memory_space<vmem>>, vector<16x128xbf16>
    %c0_4 = arith.constant 0 : index
    %c0_5 = arith.constant 0 : index
    %5 = vector.load %arg4[%c0_4, %c0_5] : memref<128x128xbf16, #tpu.memory_space<vmem>>, vector<128x128xbf16>
    %cst = arith.constant dense<0.000000e+00> : vector<16x128xf32>
    %6 = tpu.matmul %4, %5, %cst {dimension_numbers = #tpu.dot_dimension_numbers<[1], [1], [0], [0], [0, 0, 1, 0], [], []>} : vector<16x128xbf16>, vector<128x128xbf16>, vector<16x128xf32> -> vector<16x128xf32>
    %7 = arith.addf %3, %6 : vector<16x128xf32>
    %c0_6 = arith.constant 0 : index
    %c0_7 = arith.constant 0 : index
    %8 = vector.load %arg7[%c0_6, %c0_7] : memref<16x128xf32, #tpu.memory_space<vmem>>, vector<16x128xf32>
    tpu.vector_store %arg7[%c0_6, %c0_7], %7 {strides = array<i32>} : memref<16x128xf32, #tpu.memory_space<vmem>>, vector<16x128xf32>,
    %c0_i32_8 = arith.constant 0 : i32
    %9 = arith.cmpi eq, %arg2, %c0_i32_8 : i32
    %10 = arith.extui %9 : i1 to i32
    %c0_i32_9 = arith.constant 0 : i32
    %11 = arith.cmpi ne, %10, %c0_i32_9 : i32
    scf.if %11 {
      %c0_10 = arith.constant 0 : index
      %c0_11 = arith.constant 0 : index
      %12 = vector.load %arg7[%c0_10, %c0_11] : memref<16x128xf32, #tpu.memory_space<vmem>>, vector<16x128xf32>
      %c0_12 = arith.constant 0 : index
      %c0_13 = arith.constant 0 : index
      %13 = vector.load %arg5[%c0_12, %c0_13] : memref<16x1xf32, #tpu.memory_space<vmem>>, vector<16x1xf32>
      %14 = vector.broadcast %13 : vector<16x1xf32> to vector<16x128xf32>
      %15 = arith.mulf %12, %14 : vector<16x128xf32>
      %c0_14 = arith.constant 0 : index
      %c0_15 = arith.constant 0 : index
      %16 = vector.load %arg6[%c0_14, %c0_15] : memref<1x128xf32, #tpu.memory_space<vmem>>, vector<1x128xf32>
      %17 = vector.broadcast %16 : vector<1x128xf32> to vector<16x128xf32>
      %18 = arith.mulf %15, %17 : vector<16x128xf32>
      %c0_16 = arith.constant 0 : index
      %c0_17 = arith.constant 0 : index
      %19 = vector.load %arg7[%c0_16, %c0_17] : memref<16x128xf32, #tpu.memory_space<vmem>>, vector<16x128xf32>
      tpu.vector_store %arg7[%c0_16, %c0_17], %18 {strides = array<i32>} : memref<16x128xf32, #tpu.memory_space<vmem>>, vector<16x128xf32>,
    } else {
    }
    return
  }
  func.func @transform_0(%arg0: i32, %arg1: i32, %arg2: i32) -> (i32, i32) {
    %c0_i32 = arith.constant 0 : i32
    return %arg0, %arg2 : i32, i32
  }
  func.func @transform_1(%arg0: i32, %arg1: i32, %arg2: i32) -> (i32, i32) {
    %c0_i32 = arith.constant 0 : i32
    return %arg1, %arg2 : i32, i32
  }
  func.func @transform_2(%arg0: i32, %arg1: i32, %arg2: i32) -> (i32, i32) {
    %c0_i32 = arith.constant 0 : i32
    %c0_i32_0 = arith.constant 0 : i32
    return %arg0, %c0_i32 : i32, i32
  }
  func.func @transform_3(%arg0: i32, %arg1: i32, %arg2: i32) -> (i32, i32) {
    %c0_i32 = arith.constant 0 : i32
    %c0_i32_0 = arith.constant 0 : i32
    return %c0_i32, %arg1 : i32, i32
  }
  func.func @transform_4(%arg0: i32, %arg1: i32, %arg2: i32) -> (i32, i32) {
    %c0_i32 = arith.constant 0 : i32
    return %arg0, %arg1 : i32, i32
  }
}

</mosaic_0001>

<bundles_post_ra>
// kernel: tpu_custom_call.1
= control target key start
LH: loop header
LB: loop body
LE: loop exit
PB: predicated region body
PF: predicated region fallthrough
CT: control target
= control target key end

     0   :  { %9 = vsyncpa [#allocation3], 0  ;;  %s381_s0 = inlined_call_operand.vmem [shape: bf16[16,128], index: 0, kind: input, shape index: {}]   ;;  %s382_s1 = inlined_call_operand.hbm [shape: bf16[128,128], index: 1, kind: input, shape index: {}]   ;;  %s383_s2 = inlined_call_operand.vmem [shape: f32[16,1], index: 2, kind: input, shape index: {}]   ;;  %s384_s3 = inlined_call_operand.vmem [shape: f32[1,128], index: 3, kind: input, shape index: {}]   ;;  %s385_s4 = inlined_call_operand.hbm [shape: f32[16,128], index: 4, kind: output, shape index: {}]  }
   0x1   :  { %10 = vsyncpa [#allocation4], 0  ;;  %s311_s15 = smov [#allocation2]   ;;  %s263_s19 = scalar_lea.hbm %s382_s1, 1024 }
   0x2   :  { %s18_s16 = sshll.u32 %s311_s15, 4  ;;  %p264_p0 = scmp.ne.s32.totalorder %s382_s1, %s263_s19  ;;  %s19_s16 = int_to_ptr.vmem [resolvable:$true] %s18_s16 }
   0x3   :  { %p267_p1 = scmp.lt.u32.totalorder %s263_s19, %s382_s1 }
   0x5   :  { %p269_p2 = pnand %p267_p1, %p264_p0 }
   0x7   :  { %272 = shalt.err (!%p269_p2)
}
   0x8   :  { %s273_s24 = scalar_lea.vmem %s19_s16, 1024  ;;  %p278_p4 = scmp.lt.s32.totalorder %s19_s16, %s19_s16 }
   0x9   :  { %p274_p3 = scmp.ne.s32.totalorder %s19_s16, %s273_s24  ;;  %p279_p5 = scmp.lt.s32.totalorder %s273_s24, %s273_s24 }
   0xb   :  { %p280_p6 = por %p279_p5, %p278_p4 }
   0xd   :  { %p281_p7 = pnand %p280_p6, %p274_p3 }
   0xf   :  { %284 = shalt.err (!%p281_p7)
}
  0x10   :  { %s312_s25 = smov 64   ;;  %s313_s26 = smov 4  }
  0x11   :  { %24 = dma.hbm_to_vmem [thread:$0]  %s382_s1, 1024, %s19_s16, [#allocation3], %s312_s25, %s312_s25, %s313_s26  }
  0x12   :  { %307 = dma.done.wait [#allocation3], 1024  }
  0x13   :  { %308 = vsyncadd [#allocation3], 4294966272  ;;  %v314_v0 = vmov 0.0   ;;  %vm315_vm0 = vmmov 0   ;;  %v316_v1 = vmov 0   ;;  %v254_v2 = vld [vmem:[#allocation2] sm:$0xff]  }
  0x14   :  { %224 = vmatprep.subr.bf16.mxu0 %v314_v0  ;;  %240 = vmatprep.mubr.msk.bf16.mxu0 %vm315_vm0, %v314_v0  ;;  %v255_v3 = vld [vmem:[#allocation2 + $0x8] sm:$0xff]   ;;  %v163_v4 = vld [vmem:[%s383_s2] sm:$0xff]  ;;  %v256_v6 = vld [vmem:[#allocation2 + $0x10] sm:$0xff]   ;;  %s317_s9 = smov [#allocation5]  }
  0x15   :  { %253 = vset.pattern.permute.xlu0 %v316_v1  ;;  %225 = vmatpush3.bf16.xpose.msra.mxu0 %v254_v2  ;;  %v164_v5 = vld [vmem:[%s383_s2 + $0x8] sm:$0xff]  ;;  %v257_v7 = vld [vmem:[#allocation2 + $0x18] sm:$0xff]   ;;  %v258_v8 = vld [vmem:[#allocation2 + $0x20] sm:$0xff]   ;;  %s193_s10 = sshll.u32 %s317_s9, 4  ;;  %s194_s10 = int_to_ptr.vmem [resolvable:$true] %s193_s10 }
  0x16   :  { %226 = vmatprep.subr.bf16.mxu0 %v314_v0  ;;  %167 = vperm.xlu0 %253, %v163_v4   ;;  %v259_v9 = vld [vmem:[#allocation2 + $0x28] sm:$0xff]   ;;  %v260_v10 = vld [vmem:[#allocation2 + $0x30] sm:$0xff]   ;;  %v261_v11 = vld [vmem:[#allocation2 + $0x38] sm:$0xff]   ;;  %p290_p9 = scmp.lt.s32.totalorder %s194_s10, %s194_s10 }
  0x17   :  { %v262_v12 = vld [vmem:[%s381_s0] sm:$0xff]   ;;  %s285_s0 = scalar_lea.vmem %s194_s10, 256 }
  0x18   :  { %v214_v17 = vld [vmem:[%s384_s3] ss:$0 sm:$0xff]  ;;  %p286_p8 = scmp.ne.s32.totalorder %s194_s10, %s285_s0  ;;  %p291_p10 = scmp.lt.s32.totalorder %s285_s0, %s285_s0 }
  0x1a   :  { %172 = vperm.xlu0 %253, %v164_v5   ;;  %p292_p11 = por %p291_p10, %p290_p9 }
  0x1c   :  { %p293_p12 = pnand %p292_p11, %p286_p8 }
  0x1d   :  { %227 = vmatpush3.bf16.xpose.msra.mxu0 %v255_v3 }
  0x1e   :  { %228 = vmatprep.subr.bf16.mxu0 %v314_v0 }
  0x25   :  { %229 = vmatpush3.bf16.xpose.msra.mxu0 %v256_v6 }
  0x26   :  { %230 = vmatprep.subr.bf16.mxu0 %v314_v0 }
  0x2d   :  { %231 = vmatpush3.bf16.xpose.msra.mxu0 %v257_v7 }
  0x2e   :  { %232 = vmatprep.subr.bf16.mxu0 %v314_v0 }
  0x35   :  { %233 = vmatpush3.bf16.xpose.msra.mxu0 %v258_v8 }
  0x36   :  { %234 = vmatprep.subr.bf16.mxu0 %v314_v0 }
  0x3d   :  { %235 = vmatpush3.bf16.xpose.msra.mxu0 %v259_v9 }
  0x3e   :  { %236 = vmatprep.subr.bf16.mxu0 %v314_v0 }
  0x45   :  { %237 = vmatpush3.bf16.xpose.msra.mxu0 %v260_v10 }
  0x46   :  { %238 = vmatprep.subr.bf16.mxu0 %v314_v0 }
  0x4d   :  { %239 = vmatpush3.bf16.xpose.msra.mxu0 %v261_v11 }
  0x54   :  { %241 = vmatmul.mubr.bf16.vlgmr.msra.gmra.mrb[0].mxu0 %v262_v12 }
  0x95   :  { %v168_v13 = vpop.permute.xlu0 %167 }
  0x99   :  { %v173_v20 = vpop.permute.xlu0 %172 }
 0x127   :  { %v147_v14 = vpop.f32.mrb[0].mxu0 }
 0x128   :  { %v242_v15 = vpop.f32.mrb[1].mxu0  ;;  %v175_v19 = vmul.f32 %v168_v13, %v147_v14 }
 0x129   :  { %v150_v16 = vpop.f32.mrb[2].mxu0 }
 0x12a   :  { %v243_v18 = vpop.f32.mrb[3].mxu0  ;;  %v184_v21 = vmul.f32 %v214_v17, %v175_v19  ;;  %v176_v22 = vmul.f32 %v173_v20, %v150_v16 }
 0x12c   :  { %186 = vst [vmem:[#allocation5] sm:$0xff] %v184_v21  ;;  %v185_v23 = vmul.f32 %v214_v17, %v176_v22 }
 0x12e   :  { %187 = vst [vmem:[#allocation5 + $0x8] sm:$0xff] %v185_v23 }
 0x12f   :  { %296 = shalt.err (!%p293_p12)
}
 0x130   :  { %s297_s12 = scalar_lea.hbm %s385_s4, 256 }
 0x131   :  { %p298_p13 = scmp.ne.s32.totalorder %s385_s4, %s297_s12  ;;  %p301_p0 = scmp.lt.u32.totalorder %s297_s12, %s385_s4 }
 0x133   :  { %p303_p1 = pnand %p301_p0, %p298_p13 }
 0x135   :  { %306 = shalt.err (!%p303_p1)
}
 0x136   :  { %s318_s17 = smov 128   ;;  %s319_s18 = smov 8  }
 0x137   :  { %199 = dma.vmem_to_hbm [thread:$0]  %s194_s10, 256, %s385_s4, [#allocation4], %s318_s17, %s318_s17, %s319_s18  }
 0x138   :  { %309 = dma.done.wait [#allocation4], 256  }
 0x139   :  { %310 = vsyncadd [#allocation4], 4294967040 }
 0x13a   :  { %203 = vsyncpa [#allocation3], 1 }
 0x13b   :  { %204 = vsyncpa [#allocation4], 1 }

</bundles_post_ra>
